<compile_context>
chip_gen: v7x
topology: tpu7x:2x2x1
jax: 0.10.0
libtpu: 0.0.40
codegen_flags: <defaults>
</compile_context>

<pallas_src>
from collections import namedtuple

import jax
import jax.numpy as jnp
from jax.experimental import pallas as pl
from jax.experimental.pallas import tpu as pltpu


_VMEM_LIMIT = 48 * 1024 * 1024  # leave headroom even on v7x's 64 MiB VMEM


# -----------------------------------------------------------------------------
# Pallas kernels
# -----------------------------------------------------------------------------
def _conv3x3_fused_kernel(xp_ref, w_ref, b_ref, o_ref):
    """Fused 3x3 conv (single K=9*Cin matmul) + bias + ReLU.

    xp_ref: (1, H+2, W+2, Cin) bf16  zero-padded image; block index depends
            only on the batch grid axis, so Pallas re-uses the DMA across the
            inner (cout, row) grid axes.
    w_ref : (9*Cin, TCout)     bf16  weights, (kh, kw, cin)-major contraction.
    b_ref : (1, TCout)         f32
    o_ref : (1, TH*W, TCout)   f32   lane-dense flattened-spatial output tile.
    """
    cin = xp_ref.shape[3]
    w_out = xp_ref.shape[2] - 2
    thw = o_ref.shape[1]
    th = thw // w_out

    r = pl.program_id(2)                       # row-tile index
    row0 = pl.multiple_of(r * th, th)
    xp = xp_ref[0, pl.ds(row0, th + 2), :, :]  # (TH+2, W+2, Cin)

    # In-VMEM im2col: 9 shifted views concatenated on the channel (lane) axis.
    taps = [xp[kh:kh + th, kw:kw + w_out, :]
            for kh in range(3) for kw in range(3)]
    patches = jnp.concatenate(taps, axis=-1).reshape(thw, 9 * cin)

    acc = jnp.dot(patches, w_ref[...], preferred_element_type=jnp.float32)
    acc = acc + b_ref[...]                     # (THW, TCout) + (1, TCout)
    o_ref[0] = jnp.maximum(acc, 0.0).astype(o_ref.dtype)


def _mm_bias_relu_kernel(x_ref, w_ref, b_ref, o_ref):
    """Dense matmul + bias + ReLU (used for the Cin=3 first conv, K=27)."""
    acc = jnp.dot(x_ref[0], w_ref[...], preferred_element_type=jnp.float32)
    acc = acc + b_ref[...]
    o_ref[0] = jnp.maximum(acc, 0.0).astype(o_ref.dtype)


def _maxpool2x2_kernel(x_ref, o_ref):
    """2x2 / stride-2 max pool on a (1, TH, 2, Wo, 2*C) bitcast view of x."""
    c = o_ref.shape[3]
    v = jnp.maximum(x_ref[0, :, 0], x_ref[0, :, 1])   # row-pair max (TH, Wo, 2C)
    o_ref[0] = jnp.maximum(v[..., :c], v[..., c:])    # col-pair max (TH, Wo, C)


# -----------------------------------------------------------------------------
# Wrappers
# -----------------------------------------------------------------------------
def _largest_row_tile(h, w, max_rows=1024):
    """Largest divisor `t` of h with t*w <= max_rows and t*w % 8 == 0."""
    cands = [t for t in range(1, h + 1)
             if h % t == 0 and t * w <= max_rows and (t * w) % 8 == 0]
    return max(cands) if cands else h


def _conv3x3_relu_generic(x, w, b):
    """x: (N,H,W,Cin) f32; w: (3,3,Cin,Cout); b: (Cout,) -> (N,H,W,Cout) f32."""
    n, h, wd, cin = x.shape
    cout = w.shape[-1]
    hw = h * wd
    tile_cout = min(cout, 128)
    tile_h = _largest_row_tile(h, wd)

    # Pad once, cast to bf16 (single fused XLA pass); no HBM im2col.
    xp = jnp.pad(x, ((0, 0), (1, 1), (1, 1), (0, 0))).astype(jnp.bfloat16)
    wf = w.reshape(9 * cin, cout).astype(jnp.bfloat16)
    bf = b.reshape(1, cout).astype(jnp.float32)

    grid = (n, cout // tile_cout, h // tile_h)
    out = pl.pallas_call(
        _conv3x3_fused_kernel,
        out_shape=jax.ShapeDtypeStruct((n, hw, cout), jnp.float32),
        grid=grid,
        in_specs=[
            # full padded image per batch element (re-used across inner axes)
            pl.BlockSpec((1, h + 2, wd + 2, cin), lambda b_, co, r: (b_, 0, 0, 0)),
            # weights indexed only by the Cout axis -> re-used across row tiles
            pl.BlockSpec((9 * cin, tile_cout), lambda b_, co, r: (0, co)),
            pl.BlockSpec((1, tile_cout), lambda b_, co, r: (0, co)),
        ],
        out_specs=pl.BlockSpec((1, tile_h * wd, tile_cout),
                               lambda b_, co, r: (b_, r, co)),
        compiler_params=pltpu.CompilerParams(
            dimension_semantics=("parallel", "parallel", "arbitrary"),
            vmem_limit_bytes=_VMEM_LIMIT,
        ),
    )(xp, wf, bf)
    return out.reshape(n, h, wd, cout)


def _conv3x3_relu_small_cin(x, w, b):
    """Cin==3 path: fold taps into the contraction in the wrapper (K=27)."""
    n, h, wd, cin = x.shape
    cout = w.shape[-1]
    hw = h * wd
    tile_cout = min(cout, 128)
    tile_m = _largest_row_tile(hw, 1, max_rows=2048)

    xp = jnp.pad(x, ((0, 0), (1, 1), (1, 1), (0, 0))).astype(jnp.bfloat16)
    # 9x duplication of a 3-channel input is negligible (27 channels total).
    cols = jnp.concatenate(
        [xp[:, kh:kh + h, kw:kw + wd, :] for kh in range(3) for kw in range(3)],
        axis=-1,
    ).reshape(n, hw, 9 * cin)
    wf = w.reshape(9 * cin, cout).astype(jnp.bfloat16)
    bf = b.reshape(1, cout).astype(jnp.float32)

    grid = (n, cout // tile_cout, hw // tile_m)
    out = pl.pallas_call(
        _mm_bias_relu_kernel,
        out_shape=jax.ShapeDtypeStruct((n, hw, cout), jnp.float32),
        grid=grid,
        in_specs=[
            pl.BlockSpec((1, tile_m, 9 * cin), lambda b_, co, r: (b_, r, 0)),
            pl.BlockSpec((9 * cin, tile_cout), lambda b_, co, r: (0, co)),
            pl.BlockSpec((1, tile_cout), lambda b_, co, r: (0, co)),
        ],
        out_specs=pl.BlockSpec((1, tile_m, tile_cout),
                               lambda b_, co, r: (b_, r, co)),
        compiler_params=pltpu.CompilerParams(
            dimension_semantics=("parallel", "parallel", "arbitrary"),
            vmem_limit_bytes=_VMEM_LIMIT,
        ),
    )(cols, wf, bf)
    return out.reshape(n, h, wd, cout)


def conv3x3_relu(x, w, b):
    if x.shape[-1] < 8:
        return _conv3x3_relu_small_cin(x, w, b)
    return _conv3x3_relu_generic(x, w, b)


def maxpool2x2(x):
    """x: (N,H,W,C) f32 -> (N,H//2,W//2,C); single-pass, no HBM phase copies."""
    n, h, wd, c = x.shape
    assert h % 2 == 0 and wd % 2 == 0, "maxpool2x2 requires even H and W"
    ho, wo = h // 2, wd // 2
    xr = x.reshape(n, ho, 2, wo, 2 * c)   # pure row-major bitcast view
    tile_h = _largest_row_tile(ho, wo, max_rows=4096)
    grid = (n, ho // tile_h)
    return pl.pallas_call(
        _maxpool2x2_kernel,
        out_shape=jax.ShapeDtypeStruct((n, ho, wo, c), jnp.float32),
        grid=grid,
        in_specs=[pl.BlockSpec((1, tile_h, 2, wo, 2 * c),
                               lambda b_, r: (b_, r, 0, 0, 0))],
        out_specs=pl.BlockSpec((1, tile_h, wo, c), lambda b_, r: (b_, r, 0, 0)),
        compiler_params=pltpu.CompilerParams(
            dimension_semantics=("parallel", "parallel"),
            vmem_limit_bytes=_VMEM_LIMIT,
        ),
    )(xr)
    # TODO(synk): the pool could additionally be fused into the preceding
    # conv's epilogue to remove this mem-bound pass entirely.


# -----------------------------------------------------------------------------
# Vgg16 module (features[0:23], outputs relu1_2 / relu2_2 / relu3_3 / relu4_3)
# -----------------------------------------------------------------------------
_CONV_CFG = [
    (3, 64), (64, 64),                       # slice1 -> relu1_2
    (64, 128), (128, 128),                   # slice2 -> relu2_2
    (128, 256), (256, 256), (256, 256),      # slice3 -> relu3_3
    (256, 512), (512, 512), (512, 512),      # slice4 -> relu4_3
]

VggOutputs = namedtuple("VggOutputs", ["relu1_2", "relu2_2", "relu3_3", "relu4_3"])


def init_vgg16_params(key):
    params = []
    for i, (cin, cout) in enumerate(_CONV_CFG):
        kw, kb = jax.random.split(jax.random.fold_in(key, i))
        std = (2.0 / (9 * cin)) ** 0.5
        w = std * jax.random.normal(kw, (3, 3, cin, cout), dtype=jnp.float32)
        b = 0.01 * jax.random.normal(kb, (cout,), dtype=jnp.float32)
        params.append((w, b))
    return params


def vgg16_forward(x_nchw, params):
    """x_nchw: (N, 3, H, W) float32 -> VggOutputs of NCHW feature maps."""
    h = jnp.transpose(x_nchw, (0, 2, 3, 1)).astype(jnp.float32)  # NCHW -> NHWC

    # slice1
    h = conv3x3_relu(h, *params[0])
    h = conv3x3_relu(h, *params[1])
    relu1_2 = h
    # slice2
    h = maxpool2x2(h)
    h = conv3x3_relu(h, *params[2])
    h = conv3x3_relu(h, *params[3])
    relu2_2 = h
    # slice3
    h = maxpool2x2(h)
    h = conv3x3_relu(h, *params[4])
    h = conv3x3_relu(h, *params[5])
    h = conv3x3_relu(h, *params[6])
    relu3_3 = h
    # slice4
    h = maxpool2x2(h)
    h = conv3x3_relu(h, *params[7])
    h = conv3x3_relu(h, *params[8])
    h = conv3x3_relu(h, *params[9])
    relu4_3 = h

    to_nchw = lambda t: jnp.transpose(t, (0, 3, 1, 2))
    return VggOutputs(
        to_nchw(relu1_2), to_nchw(relu2_2), to_nchw(relu3_3), to_nchw(relu4_3)
    )


# -----------------------------------------------------------------------------
# Reference (XLA) ops for sanity checks
# -----------------------------------------------------------------------------
def _ref_conv3x3_relu(x, w, b):
    xb = x.astype(jnp.bfloat16)
    wb = w.astype(jnp.bfloat16)
    y = jax.lax.conv_general_dilated(
        xb, wb, window_strides=(1, 1), padding="SAME",
        dimension_numbers=("NHWC", "HWIO", "NHWC"),
        preferred_element_type=jnp.float32)
    return jnp.maximum(y + b.reshape(1, 1, 1, -1), 0.0)


if __name__ == "__main__":
    key = jax.random.PRNGKey(0)
    k_x, k_p, k_t = jax.random.split(key, 3)

    # ---- small standalone correctness checks against XLA references ----
    k1, k2, k3, k4, k5, k6 = jax.random.split(k_t, 6)
    xs = jax.random.normal(k1, (1, 8, 8, 64), jnp.float32)
    ws = 0.05 * jax.random.normal(k2, (3, 3, 64, 64), jnp.float32)
    bs = 0.01 * jax.random.normal(k3, (64,), jnp.float32)
    assert jnp.allclose(conv3x3_relu(xs, ws, bs), _ref_conv3x3_relu(xs, ws, bs),
                        atol=2e-2, rtol=2e-2), "generic conv mismatch"

    xs3 = jax.random.normal(k4, (1, 8, 8, 3), jnp.float32)
    ws3 = 0.2 * jax.random.normal(k5, (3, 3, 3, 64), jnp.float32)
    bs3 = 0.01 * jax.random.normal(k6, (64,), jnp.float32)
    assert jnp.allclose(conv3x3_relu(xs3, ws3, bs3),
                        _ref_conv3x3_relu(xs3, ws3, bs3),
                        atol=2e-2, rtol=2e-2), "cin=3 conv mismatch"

    pool_ref = jnp.max(xs.reshape(1, 4, 2, 4, 2, 64), axis=(2, 4))
    assert jnp.array_equal(maxpool2x2(xs), pool_ref), "maxpool mismatch"

    # ---- full forward on a small input (64x64 keeps every layer's W a
    #      multiple of 8 through the three pools: 64 -> 32 -> 16 -> 8) ----
    x = jax.random.normal(k_x, (2, 3, 64, 64), dtype=jnp.float32)
    params = init_vgg16_params(k_p)

    fwd = jax.jit(vgg16_forward)
    out = jax.block_until_ready(fwd(x, params))

    assert out.relu1_2.shape == (2, 64, 64, 64)
    assert out.relu2_2.shape == (2, 128, 32, 32)
    assert out.relu3_3.shape == (2, 256, 16, 16)
    assert out.relu4_3.shape == (2, 512, 8, 8)

    print("KERNEL_OK")
</pallas_src>

<mosaic_0001>
module attributes {stable_mosaic.version = 11 : i64} {
  func.func @_conv3x3_fused_kernel(%arg0: i32, %arg1: i32, %arg2: i32, %arg3: memref<1x10x10x64xbf16, #tpu.memory_space<vmem>>, %arg4: memref<576x64xbf16, #tpu.memory_space<vmem>>, %arg5: memref<1x64xf32, #tpu.memory_space<vmem>>, %arg6: memref<1x64x64xf32, #tpu.memory_space<vmem>>) attributes {dimension_semantics = [#tpu.dimension_semantics<parallel>, #tpu.dimension_semantics<parallel>, #tpu.dimension_semantics<arbitrary>], iteration_bounds = array<i64: 1, 1, 1>, scalar_prefetch = 0 : i64, scratch_operands = 0 : i64, tpu.core_type = #tpu.core_type<tc>, window_params = [{transform_indices = @transform_0, window_bounds = array<i64: 1, 10, 10, 64>}, {transform_indices = @transform_1, window_bounds = array<i64: 576, 64>}, {transform_indices = @transform_2, window_bounds = array<i64: 1, 64>}, {transform_indices = @transform_3, window_bounds = array<i64: 1, 64, 64>}]} {
    %c8_i32 = arith.constant 8 : i32
    %0 = arith.muli %arg2, %c8_i32 : i32
    %1 = tpu.assume_multiple %0, 8 : i32
    %c0 = arith.constant 0 : index
    %2 = arith.index_cast %1 : i32 to index
    %c0_0 = arith.constant 0 : index
    %c0_1 = arith.constant 0 : index
    %3 = vector.load %arg3[%c0, %2, %c0_0, %c0_1] : memref<1x10x10x64xbf16, #tpu.memory_space<vmem>>, vector<1x10x10x64xbf16>
    %4 = vector.shape_cast %3 : vector<1x10x10x64xbf16> to vector<10x10x64xbf16>
    %5 = vector.extract_strided_slice %4 {offsets = [0, 0, 0], sizes = [8, 8, 64], strides = [1, 1, 1]} : vector<10x10x64xbf16> to vector<8x8x64xbf16>
    %6 = vector.extract_strided_slice %4 {offsets = [0, 1, 0], sizes = [8, 8, 64], strides = [1, 1, 1]} : vector<10x10x64xbf16> to vector<8x8x64xbf16>
    %7 = vector.extract_strided_slice %4 {offsets = [0, 2, 0], sizes = [8, 8, 64], strides = [1, 1, 1]} : vector<10x10x64xbf16> to vector<8x8x64xbf16>
    %8 = vector.extract_strided_slice %4 {offsets = [1, 0, 0], sizes = [8, 8, 64], strides = [1, 1, 1]} : vector<10x10x64xbf16> to vector<8x8x64xbf16>
    %9 = vector.extract_strided_slice %4 {offsets = [1, 1, 0], sizes = [8, 8, 64], strides = [1, 1, 1]} : vector<10x10x64xbf16> to vector<8x8x64xbf16>
    %10 = vector.extract_strided_slice %4 {offsets = [1, 2, 0], sizes = [8, 8, 64], strides = [1, 1, 1]} : vector<10x10x64xbf16> to vector<8x8x64xbf16>
    %11 = vector.extract_strided_slice %4 {offsets = [2, 0, 0], sizes = [8, 8, 64], strides = [1, 1, 1]} : vector<10x10x64xbf16> to vector<8x8x64xbf16>
    %12 = vector.extract_strided_slice %4 {offsets = [2, 1, 0], sizes = [8, 8, 64], strides = [1, 1, 1]} : vector<10x10x64xbf16> to vector<8x8x64xbf16>
    %13 = vector.extract_strided_slice %4 {offsets = [2, 2, 0], sizes = [8, 8, 64], strides = [1, 1, 1]} : vector<10x10x64xbf16> to vector<8x8x64xbf16>
    %14 = tpu.concatenate %5, %6, %7, %8, %9, %10, %11, %12, %13 in 2 : vector<8x8x64xbf16>, vector<8x8x64xbf16>, vector<8x8x64xbf16>, vector<8x8x64xbf16>, vector<8x8x64xbf16>, vector<8x8x64xbf16>, vector<8x8x64xbf16>, vector<8x8x64xbf16>, vector<8x8x64xbf16> -> vector<8x8x576xbf16>
    %15 = vector.shape_cast %14 : vector<8x8x576xbf16> to vector<64x576xbf16>
    %c0_2 = arith.constant 0 : index
    %c0_3 = arith.constant 0 : index
    %16 = vector.load %arg4[%c0_2, %c0_3] : memref<576x64xbf16, #tpu.memory_space<vmem>>, vector<576x64xbf16>
    %cst = arith.constant dense<0.000000e+00> : vector<64x64xf32>
    %17 = tpu.matmul %15, %16, %cst {dimension_numbers = #tpu.dot_dimension_numbers<[1], [0], [0], [1], [0, 0, 1, 1], [], []>} : vector<64x576xbf16>, vector<576x64xbf16>, vector<64x64xf32> -> vector<64x64xf32>
    %c0_4 = arith.constant 0 : index
    %c0_5 = arith.constant 0 : index
    %18 = vector.load %arg5[%c0_4, %c0_5] : memref<1x64xf32, #tpu.memory_space<vmem>>, vector<1x64xf32>
    %19 = vector.broadcast %18 : vector<1x64xf32> to vector<64x64xf32>
    %20 = arith.addf %17, %19 : vector<64x64xf32>
    %cst_6 = arith.constant 0.000000e+00 : f32
    %21 = vector.broadcast %cst_6 : f32 to vector<64x64xf32>
    %22 = arith.maximumf %20, %21 : vector<64x64xf32>
    %c0_7 = arith.constant 0 : index
    %c0_8 = arith.constant 0 : index
    %c0_9 = arith.constant 0 : index
    %23 = vector.load %arg6[%c0_7, %c0_8, %c0_9] : memref<1x64x64xf32, #tpu.memory_space<vmem>>, vector<1x64x64xf32>
    %24 = vector.shape_cast %23 : vector<1x64x64xf32> to vector<64x64xf32>
    %25 = vector.shape_cast %22 : vector<64x64xf32> to vector<1x64x64xf32>
    tpu.vector_store %arg6[%c0_7, %c0_8, %c0_9], %25 {strides = array<i32>} : memref<1x64x64xf32, #tpu.memory_space<vmem>>, vector<1x64x64xf32>,
    return
  }
  func.func @transform_0(%arg0: i32, %arg1: i32, %arg2: i32) -> (i32, i32, i32, i32) {
    %c0_i32 = arith.constant 0 : i32
    %c0_i32_0 = arith.constant 0 : i32
    %c0_i32_1 = arith.constant 0 : i32
    %c0_i32_2 = arith.constant 0 : i32
    return %arg0, %c0_i32, %c0_i32_0, %c0_i32_1 : i32, i32, i32, i32
  }
  func.func @transform_1(%arg0: i32, %arg1: i32, %arg2: i32) -> (i32, i32) {
    %c0_i32 = arith.constant 0 : i32
    %c0_i32_0 = arith.constant 0 : i32
    return %c0_i32, %arg1 : i32, i32
  }
  func.func @transform_2(%arg0: i32, %arg1: i32, %arg2: i32) -> (i32, i32) {
    %c0_i32 = arith.constant 0 : i32
    %c0_i32_0 = arith.constant 0 : i32
    return %c0_i32, %arg1 : i32, i32
  }
  func.func @transform_3(%arg0: i32, %arg1: i32, %arg2: i32) -> (i32, i32, i32) {
    %c0_i32 = arith.constant 0 : i32
    return %arg0, %arg2, %arg1 : i32, i32, i32
  }
}

</mosaic_0001>

<bundles_post_ra>
// kernel: tpu_custom_call.1
= control target key start
LH: loop header
LB: loop body
LE: loop exit
PB: predicated region body
PF: predicated region fallthrough
CT: control target
= control target key end

     0   :  { %s1203_s30 = smov 64   ;;  %s1638_s0 = inlined_call_operand.vmem [shape: bf16[1,10,10,64], index: 0, kind: input, shape index: {}]   ;;  %s1639_s1 = inlined_call_operand.vmem [shape: bf16[576,64], index: 1, kind: input, shape index: {}]   ;;  %s1640_s2 = inlined_call_operand.vmem [shape: f32[1,64], index: 2, kind: input, shape index: {}]   ;;  %s1641_s3 = inlined_call_operand.hbm [shape: f32[1,64,64], index: 3, kind: output, shape index: {}]  }
   0x1   :  { %v1230_v0 = vld [vmem:[%s1638_s0 + $0x8] sm:$0xf]  ;;  %v23_v1 = vld [vmem:[%s1638_s0 + $0xc] sm:$0x1]  ;;  %v1143_v2 = vld [vmem:[%s1639_s1 + $0x40] sm:$0xff]  }
   0x2   :  { %v941_v3 = vcombine.low %v1230_v0, %v1230_v0  ;;  %v1241_v4 = vcombine.low %v1230_v0, %v23_v1  ;;  %v1246_v5 = vld [vmem:[%s1638_s0 + $0x10] sm:$0xf]  ;;  %v25_v6 = vld [vmem:[%s1638_s0 + $0x14] sm:$0x1]  ;;  %v1254_v7 = vld [vmem:[%s1638_s0 + $0x18] sm:$0xf]  ;;  %1009 = vmatprep.subr.bf16.mxu0 %v1143_v2 }
   0x3   :  { %v935_v8 = vcombine.low %v1246_v5, %v25_v6  ;;  %v942_v9 = vcombine.low %v1246_v5, %v1246_v5  ;;  %v27_v10 = vld [vmem:[%s1638_s0 + $0x1c] sm:$0x1]  ;;  %v1265_v11 = vld [vmem:[%s1638_s0] sm:$0xf]  ;;  %v21_v12 = vld [vmem:[%s1638_s0 + $0x4] sm:$0x1] }
   0x4   :  { %170 = vrot.lane.b32.xlu1 %v941_v3, %s1203_s30  ;;  %v1272_v13 = vcombine.low %v1254_v7, %v27_v10  ;;  %v88_v14 = vshrl.u32 %v1241_v4, 16  ;;  %v90_v15 = vshll.u32 %v1241_v4, 16  ;;  %v1277_v16 = vcombine.low %v1265_v11, %v21_v12  ;;  %v1282_v17 = vld [vmem:[%s1638_s0 + $0x28] sm:$0xf]  ;;  %v31_v18 = vld [vmem:[%s1638_s0 + $0x2c] sm:$0x1] }
   0x5   :  { %v95_v19 = vshrl.u32 %v935_v8, 16  ;;  %v97_v20 = vshll.u32 %v935_v8, 16  ;;  %v1291_v26 = vcombine.low %v1282_v17, %v31_v18  ;;  %v1299_v29 = vld [vmem:[%s1638_s0 + $0x20] sm:$0xf]  ;;  %v29_v30 = vld [vmem:[%s1638_s0 + $0x24] sm:$0x1] }
   0x6   :  { %v104_v21 = vshll.u32 %v1272_v13, 16  ;;  %v92_v22 = vrot.slane %v90_v15, 1  ;;  %v102_v24 = vshrl.u32 %v1272_v13, 16  ;;  %v83_v25 = vshll.u32 %v1277_v16, 16  ;;  %v1144_v33 = vld [vmem:[%s1639_s1] sm:$0xff]   ;;  %v1145_v38 = vld [vmem:[%s1639_s1 + $0x48] sm:$0xff]  }
   0x7   :  { %v99_v23 = vrot.slane %v97_v20, 1  ;;  %v118_v32 = vshll.u32 %v1291_v26, 16  ;;  %v81_v34 = vshrl.u32 %v1277_v16, 16  ;;  %v1311_v36 = vrot.slane %v935_v8, 1  ;;  %v1325_v42 = vld [vmem:[%s1638_s0 + $0x38] sm:$0xf]  ;;  %1010 = vmatpush3.bf16.msra.mxu0 %v1144_v33 }
   0x8   :  { %172 = vrot.lane.b32.xlu1 %v942_v9, %s1203_s30  ;;  %v106_v27 = vrot.slane %v104_v21, 1  ;;  %v1294_v28 = vor.u32 %v92_v22, %v88_v14  ;;  %v85_v35 = vrot.slane %v83_v25, 1  ;;  %v116_v37 = vshrl.u32 %v1291_v26, 16  ;;  %v35_v43 = vld [vmem:[%s1638_s0 + $0x3c] sm:$0x1]  ;;  %v1146_v46 = vld [vmem:[%s1639_s1 + $0xc0] sm:$0xff]   ;;  %1011 = vmatprep.subr.bf16.mxu0 %v1145_v38 }
   0x9   :  { %v1304_v31 = vor.u32 %v99_v23, %v95_v19  ;;  %v120_v40 = vrot.slane %v118_v32, 1  ;;  %v937_v41 = vcombine.low %v1299_v29, %v29_v30  ;;  %v1333_v44 = vld [vmem:[%s1638_s0 + $0x40] sm:$0xf]  ;;  %v37_v45 = vld [vmem:[%s1638_s0 + $0x44] sm:$0x1]  ;;  %1049 = vmatprep.subr.bf16.mxu1 %v1146_v46  ;;  %v1147_v49 = vld [vmem:[%s1639_s1 + $0x8] sm:$0xff]   ;;  %v1364_v54 = vcombine.low %v1325_v42, %v35_v43 }
   0xa   :  { %v1319_v39 = vor.u32 %v106_v27, %v102_v24  ;;  %v1346_v47 = vld [vmem:[%s1638_s0 + $0x48] sm:$0xf]  ;;  %v39_v48 = vld [vmem:[%s1638_s0 + $0x4c] sm:$0x1]  ;;  %v86_v50 = vor.u32 %v85_v35, %v81_v34  ;;  %v1148_v52 = vld [vmem:[%s1639_s1 + $0x80] sm:$0xff]   ;;  %v1367_v55 = vcombine.low %v1333_v44, %v37_v45  ;;  %v153_v57 = vrot.slane %v1241_v4, 1 }
   0xb   :  { %140 = vrot.lane.b32.xlu0 %v1304_v31, %s1203_s30  ;;  %v111_v51 = vshll.u32 %v937_v41, 16  ;;  %1012 = vmatpush3.bf16.msra.mxu0 %v1147_v49  ;;  %v1361_v53 = vor.u32 %v120_v40, %v116_v37  ;;  %v1370_v56 = vcombine.low %v1346_v47, %v39_v48  ;;  %v109_v58 = vshrl.u32 %v937_v41, 16  ;;  %v1149_v59 = vld [vmem:[%s1639_s1 + $0x50] sm:$0xff]   ;;  %v1150_v2 = vld [vmem:[%s1639_s1 + $0xc8] sm:$0xff]   ;;  %v1153_v19 = vld [vmem:[%s1639_s1 + $0x58] sm:$0xff]  }
   0xc   :  { %138 = vrot.lane.b32.xlu1 %v1294_v28, %s1203_s30  ;;  %1050 = vmatpush3.bf16.msra.mxu1 %v1148_v52  ;;  %v1376_v60 = vrot.slane %v937_v41, 1  ;;  %v1381_v61 = vld [vmem:[%s1638_s0 + $0x30] sm:$0xf]  ;;  %v33_v62 = vld [vmem:[%s1638_s0 + $0x34] sm:$0x1]  ;;  %v196_v63 = vrot.slane %v1367_v55, 1  ;;  %v944_v8 = vcombine.low %v1299_v29, %v1299_v29  ;;  %v943_v24 = vcombine.low %v1254_v7, %v1254_v7 }
   0xd   :  { %v229_v1 = vrot.slane %v1370_v56, 1  ;;  %v113_v3 = vrot.slane %v111_v51, 1  ;;  %1013 = vmatprep.subr.bf16.mxu0 %v1149_v59  ;;  %v1151_v6 = vld [vmem:[%s1639_s1 + $0x10] sm:$0xff]   ;;  %v132_v9 = vshll.u32 %v1364_v54, 16  ;;  %1051 = vmatprep.subr.bf16.mxu1 %v1150_v2  ;;  %v1152_v12 = vld [vmem:[%s1639_s1 + $0x88] sm:$0xff]   ;;  %v130_v15 = vshrl.u32 %v1364_v54, 16 }
   0xe   :  { %v939_v18 = vcombine.low %v1381_v61, %v33_v62  ;;  %v1154_v21 = vld [vmem:[%s1639_s1 + $0xd0] sm:$0xff]   ;;  %v1155_v22 = vld [vmem:[%s1639_s1 + $0x18] sm:$0xff]   ;;  %v1157_v27 = vld [vmem:[%s1639_s1 + $0x60] sm:$0xff]   ;;  %v1442_v33 = vrot.slane %v1272_v13, 1  ;;  %v946_v40 = vcombine.low %v1381_v61, %v1381_v61  ;;  %v945_v59 = vcombine.low %v1282_v17, %v1282_v17 }
   0xf   :  { %142 = vrot.lane.b32.xlu0 %v1319_v39, %s1203_s30  ;;  %v1402_v10 = vcombine.low %v196_v63, %v229_v1  ;;  %1014 = vmatpush3.bf16.msra.mxu0 %v1151_v6  ;;  %v1410_v14 = vor.u32 %v113_v3, %v109_v58  ;;  %v134_v20 = vrot.slane %v132_v9, 1  ;;  %v1156_v23 = vld [vmem:[%s1639_s1 + $0x90] sm:$0xff]   ;;  %v1158_v32 = vld [vmem:[%s1639_s1 + $0xd8] sm:$0xff]   ;;  %v1159_v34 = vld [vmem:[%s1639_s1 + $0x20] sm:$0xff]   ;;  %v219_v62 = vshrl.u32 %v1370_v56, 16 }
  0x10   :  { %199 = vrot.lane.b32.xlu1 %v1311_v36, %s1203_s30  ;;  %1052 = vmatpush3.bf16.msra.mxu1 %v1152_v12  ;;  %v125_v25 = vshll.u32 %v939_v18, 16  ;;  %v123_v35 = vshrl.u32 %v939_v18, 16  ;;  %v1160_v37 = vld [vmem:[%s1639_s1 + $0x98] sm:$0xff]   ;;  %v1161_v13 = vld [vmem:[%s1639_s1 + $0x68] sm:$0xff]   ;;  %v1162_v41 = vld [vmem:[%s1639_s1 + $0xe0] sm:$0xff]   ;;  %v1471_v48 = vrot.slane %v939_v18, 1  ;;  %v948_v2 = vcombine.low %v1333_v44, %v1333_v44 }
  0x11   :  { %1015 = vmatprep.subr.bf16.mxu0 %v1153_v19  ;;  %1053 = vmatprep.subr.bf16.mxu1 %v1154_v21  ;;  %v1436_v30 = vor.u32 %v134_v20, %v130_v15  ;;  %v1163_v43 = vld [vmem:[%s1639_s1 + $0x28] sm:$0xff]   ;;  %v1164_v45 = vld [vmem:[%s1639_s1 + $0xa0] sm:$0xff]   ;;  %v1165_v49 = vld [vmem:[%s1639_s1 + $0x70] sm:$0xff]   ;;  %v192_v12 = vshll.u32 %v1367_v55, 16  ;;  %v947_v20 = vcombine.low %v1325_v42, %v1325_v42  ;;  %v190_v21 = vshrl.u32 %v1367_v55, 16 }
  0x12   :  { %v127_v38 = vrot.slane %v125_v25, 1  ;;  %v1166_v51 = vld [vmem:[%s1639_s1 + $0xe8] sm:$0xff]   ;;  %v1167_v52 = vld [vmem:[%s1639_s1 + $0x30] sm:$0xff]   ;;  %v1169_v1 = vld [vmem:[%s1639_s1 + $0x78] sm:$0xff]  }
  0x13   :  { %136 = vrot.lane.b32.xlu0 %v86_v50, %s1203_s30  ;;  %1016 = vmatpush3.bf16.msra.mxu0 %v1155_v22  ;;  %v221_v50 = vshll.u32 %v1370_v56, 16  ;;  %v1168_v58 = vld [vmem:[%s1639_s1 + $0xa8] sm:$0xff]   ;;  %v1170_v6 = vld [vmem:[%s1639_s1 + $0xf0] sm:$0xff]   ;;  %v1171_v56 = vld [vmem:[%s1639_s1 + $0x38] sm:$0xff]   ;;  %v194_v22 = vrot.slane %v192_v12, 1 }
  0x14   :  { %146 = vrot.lane.b32.xlu1 %v1361_v53, %s1203_s30  ;;  %1054 = vmatpush3.bf16.msra.mxu1 %v1156_v23  ;;  %v1469_v46 = vor.u32 %v127_v38, %v123_v35  ;;  %v1172_v9 = vld [vmem:[%s1639_s1 + $0xb0] sm:$0xff]   ;;  %v1173_v15 = vld [vmem:[%s1639_s1 + $0xf8] sm:$0xff]   ;;  %v1175_v19 = vld [vmem:[%s1639_s1 + $0x100] sm:$0xff]  }
  0x15   :  { %1017 = vmatprep.subr.bf16.mxu0 %v1157_v27  ;;  %1055 = vmatprep.subr.bf16.mxu1 %v1158_v32  ;;  %v223_v3 = vrot.slane %v221_v50, 1 }
  0x17   :  { %197 = vrot.lane.b32.xlu0 %v153_v57, %s1203_s30  ;;  %1018 = vmatpush3.bf16.msra.mxu0 %v1159_v34  ;;  %v224_v18 = vor.u32 %v223_v3, %v219_v62 }
  0x18   :  { %176 = vrot.lane.b32.xlu1 %v944_v8, %s1203_s30  ;;  %1056 = vmatpush3.bf16.msra.mxu1 %v1160_v37  ;;  %v1506_v8 = vrot.slane %v1291_v26, 1  ;;  %v1174_v26 = vld [vmem:[%s1639_s1 + $0xb8] sm:$0xff]  }
  0x19   :  { %1019 = vmatprep.subr.bf16.mxu0 %v1161_v13  ;;  %1057 = vmatprep.subr.bf16.mxu1 %v1162_v41 }
  0x1b   :  { %144 = vrot.lane.b32.xlu0 %v1410_v14, %s1203_s30  ;;  %1020 = vmatpush3.bf16.msra.mxu0 %v1163_v43 }
  0x1c   :  { %203 = vrot.lane.b32.xlu1 %v1376_v60, %s1203_s30  ;;  %1058 = vmatpush3.bf16.msra.mxu1 %v1164_v45 }
  0x1d   :  { %1021 = vmatprep.subr.bf16.mxu0 %v1165_v49  ;;  %1059 = vmatprep.subr.bf16.mxu1 %v1166_v51 }
  0x1f   :  { %174 = vrot.lane.b32.xlu0 %v943_v24, %s1203_s30  ;;  %1022 = vmatpush3.bf16.msra.mxu0 %v1167_v52 }
  0x20   :  { %150 = vrot.lane.b32.xlu1 %v1436_v30, %s1203_s30  ;;  %1060 = vmatpush3.bf16.msra.mxu1 %v1168_v58 }
  0x21   :  { %1023 = vmatprep.subr.bf16.mxu0 %v1169_v1  ;;  %1061 = vmatprep.subr.bf16.mxu1 %v1170_v6 }
  0x23   :  { %201 = vrot.lane.b32.xlu0 %v1442_v33, %s1203_s30  ;;  %1024 = vmatpush3.bf16.msra.mxu0 %v1171_v56 }
  0x24   :  { %180 = vrot.lane.b32.xlu1 %v946_v40, %s1203_s30  ;;  %1062 = vmatpush3.bf16.msra.mxu1 %v1172_v9 }
  0x25   :  { %1063 = vmatprep.subr.bf16.mxu1 %v1173_v15  ;;  %1097 = vmatprep.subr.bf16.mxu0 %v1175_v19 }
  0x27   :  { %148 = vrot.lane.b32.xlu0 %v1469_v46, %s1203_s30 }
  0x28   :  { %207 = vrot.lane.b32.xlu1 %v1471_v48, %s1203_s30  ;;  %1064 = vmatpush3.bf16.msra.mxu1 %v1174_v26 }
  0x2b   :  { %178 = vrot.lane.b32.xlu0 %v945_v59, %s1203_s30 }
  0x2c   :  { %184 = vrot.lane.b32.xlu1 %v948_v2, %s1203_s30 }
  0x2f   :  { %205 = vrot.lane.b32.xlu0 %v1506_v8, %s1203_s30 }
  0x30   :  { %227 = vrot.lane.b32.xlu1 %v224_v18, %s1203_s30 }
  0x31   :  { %8 = vsyncpa [#allocation3], 0  ;;  %1113 = vmatprep.subr.bf16.mxu1 %v1175_v19  ;;  %v1530_v23 = vor.u32 %v194_v22, %v190_v21  ;;  %v1538_v24 = vrot.slane %v1364_v54, 1  ;;  %v152_v25 = vrot.slane %v1277_v16, 1  ;;  %vm230_vm0 = vcmask 523264   ;;  %v1176_v49 = vld [vmem:[%s1639_s1 + $0x108] sm:$0xff]  }
  0x32   :  { %v1178_v62 = vld [vmem:[%s1639_s1 + $0x118] sm:$0xff]  }
  0x33   :  { %182 = vrot.lane.b32.xlu0 %v947_v20, %s1203_s30 }
  0x34   :  { %211 = vrot.lane.b32.xlu1 %v196_v63, %s1203_s30 }
  0x37   :  { %225 = vrot.lane.b32.xlu0 %v1530_v23, %s1203_s30 }
  0x3b   :  { %209 = vrot.lane.b32.xlu0 %v1538_v24, %s1203_s30 }
  0x76   :  { %v171_v27 = vpop.permute.xlu1 %170 }
  0x77   :  { %v257_v32 = vsel %vm230_vm0, %v152_v25, %v171_v27 }
  0x7a   :  { %v173_v34 = vpop.permute.xlu1 %172 }
  0x7b   :  { %v260_v55 = vsel %vm230_vm0, %v153_v57, %v173_v34 }
  0x7c   :  { %v953_v63 = vcombine.low %v257_v32, %v260_v55 }
  0x7d   :  { %v141_v35 = vpop.permute.xlu0 %140 }
  0x7e   :  { %738 = vmatprep.mubr.bf16.mxu0 %v953_v63  ;;  %v139_v37 = vpop.permute.xlu1 %138  ;;  %v239_v38 = vsel %vm230_vm0, %v1246_v5, %v141_v35 }
  0x7f   :  { %v236_v41 = vsel %vm230_vm0, %v1230_v0, %v139_v37 }
  0x81   :  { %v143_v54 = vpop.permute.xlu0 %142 }
  0x82   :  { %v242_v16 = vsel %vm230_vm0, %v1254_v7, %v143_v54  ;;  %v200_v13 = vpop.permute.xlu1 %199 }
  0x83   :  { %v955_v40 = vcombine.low %v239_v38, %v242_v16  ;;  %v284_v5 = vsel %vm230_vm0, %v1304_v31, %v200_v13 }
  0x85   :  { %803 = vmatprep.mubr.bf16.mxu1 %v955_v40  ;;  %v137_v4 = vpop.permute.xlu0 %136 }
  0x86   :  { %v233_v57 = vsel %vm230_vm0, %v1265_v11, %v137_v4  ;;  %v147_v43 = vpop.permute.xlu1 %146  ;;  %v1177_v11 = vld [vmem:[%s1639_s1 + $0x110] sm:$0xff]  }
  0x87   :  { %v952_v45 = vcombine.low %v233_v57, %v236_v41  ;;  %v248_v52 = vsel %vm230_vm0, %v1282_v17, %v147_v43 }
  0x89   :  { %739 = vmatmul.mubr.bf16.vlgmr.msra.gmra.mrb[0].mxu0 %v952_v45  ;;  %v198_v7 = vpop.permute.xlu0 %197 }
  0x8a   :  { %v281_v50 = vsel %vm230_vm0, %v1294_v28, %v198_v7  ;;  %v177_v0 = vpop.permute.xlu1 %176  ;;  %1098 = vmatpush3.bf16.msra.mxu0 %v1175_v19 }
  0x8b   :  { %v954_v51 = vcombine.low %v281_v50, %v284_v5  ;;  %1099 = vmatprep.subr.bf16.mxu0 %v1176_v49  ;;  %v266_v1 = vsel %vm230_vm0, %v1442_v33, %v177_v0 }
  0x8d   :  { %804 = vmatmul.mubr.bf16.vlgmr.msra.gmra.mrb[0].mxu1 %v954_v51  ;;  %v145_v58 = vpop.permute.xlu0 %144 }
  0x8e   :  { %v245_v31 = vsel %vm230_vm0, %v1299_v29, %v145_v58  ;;  %v204_v59 = vpop.permute.xlu1 %203  ;;  %1117 = vmatpush3.bf16.msra.mxu1 %v1175_v19  ;;  %1100 = vmatpush3.bf16.msra.mxu0 %v1176_v49 }
  0x8f   :  { %v959_v28 = vcombine.low %v245_v31, %v248_v52  ;;  %1114 = vmatprep.subr.bf16.mxu1 %v1176_v49  ;;  %1101 = vmatprep.subr.bf16.mxu0 %v1177_v11  ;;  %v290_v6 = vsel %vm230_vm0, %v1410_v14, %v204_v59 }
  0x91   :  { %811 = vmatprep.mubr.bf16.mxu1 %v959_v28  ;;  %v175_v17 = vpop.permute.xlu0 %174 }
  0x92   :  { %v263_v2 = vsel %vm230_vm0, %v1311_v36, %v175_v17  ;;  %v151_v3 = vpop.permute.xlu1 %150  ;;  %1118 = vmatpush3.bf16.msra.mxu1 %v1176_v49  ;;  %1102 = vmatpush3.bf16.msra.mxu0 %v1177_v11 }
  0x93   :  { %v957_v29 = vcombine.low %v263_v2, %v266_v1  ;;  %1115 = vmatprep.subr.bf16.mxu1 %v1177_v11  ;;  %1103 = vmatprep.subr.bf16.mxu0 %v1178_v62  ;;  %v254_v18 = vsel %vm230_vm0, %v1325_v42, %v151_v3 }
  0x95   :  { %746 = vmatprep.mubr.bf16.mxu0 %v957_v29  ;;  %v202_v56 = vpop.permute.xlu0 %201 }
  0x96   :  { %v287_v9 = vsel %vm230_vm0, %v1319_v39, %v202_v56  ;;  %747 = vmatmul.mubr.bf16.gmra.mrb[4].mxu0 %v955_v40  ;;  %v181_v12 = vpop.permute.xlu1 %180  ;;  %1119 = vmatpush3.bf16.msra.mxu1 %v1177_v11 }
  0x97   :  { %v958_v15 = vcombine.low %v287_v9, %v290_v6  ;;  %1104 = vmatpush3.bf16.msra.mxu0 %v1178_v62  ;;  %1116 = vmatprep.subr.bf16.mxu1 %v1178_v62  ;;  %v272_v39 = vsel %vm230_vm0, %v1506_v8, %v181_v12 }
  0x99   :  { %812 = vmatmul.mubr.bf16.gmra.mrb[4].mxu1 %v958_v15  ;;  %v149_v26 = vpop.permute.xlu0 %148 }
  0x9a   :  { %v251_v19 = vsel %vm230_vm0, %v1381_v61, %v149_v26  ;;  %v208_v14 = vpop.permute.xlu1 %207  ;;  %1120 = vmatpush3.bf16.msra.mxu1 %v1178_v62 }
  0x9b   :  { %v963_v20 = vcombine.low %v251_v19, %v254_v18  ;;  %v296_v42 = vsel %vm230_vm0, %v1469_v46, %v208_v14  ;;  %v956_v46 = vcombine.low %v1311_v36, %v1442_v33  ;;  %v960_v36 = vcombine.low %v1376_v60, %v1506_v8 }
  0x9c   :  { %v964_v33 = vcombine.low %v1471_v48, %v1538_v24 }
  0x9d   :  { %819 = vmatprep.mubr.bf16.mxu1 %v963_v20  ;;  %v179_v21 = vpop.permute.xlu0 %178 }
  0x9e   :  { %v269_v22 = vsel %vm230_vm0, %v1376_v60, %v179_v21  ;;  %v185_v25 = vpop.permute.xlu1 %184  ;;  %v951_v60 = vld [vmem:[%s1640_s2] ss:$0 sm:$0xff]  ;;  %s1204_s2 = smov [#allocation2]  }
  0x9f   :  { %v961_v27 = vcombine.low %v269_v22, %v272_v39  ;;  %v278_v63 = vsel %vm230_vm0, %v1538_v24, %v185_v25  ;;  %s922_s0 = sshll.u32 %s1204_s2, 4  ;;  %s923_s0 = int_to_ptr.vmem [resolvable:$true] %s922_s0 }
  0xa0   :  { %s1179_s18 = scalar_lea.vmem %s923_s0, 1024  ;;  %p1184_p1 = scmp.lt.s32.totalorder %s923_s0, %s923_s0 }
  0xa1   :  { %754 = vmatprep.mubr.bf16.mxu0 %v961_v27  ;;  %v206_v32 = vpop.permute.xlu0 %205  ;;  %p1180_p0 = scmp.ne.s32.totalorder %s923_s0, %s1179_s18  ;;  %p1185_p2 = scmp.lt.s32.totalorder %s1179_s18, %s1179_s18 }
  0xa2   :  { %v293_v61 = vsel %vm230_vm0, %v1361_v53, %v206_v32  ;;  %755 = vmatmul.mubr.bf16.gmra.mrb[8].mxu0 %v959_v28  ;;  %v228_v55 = vpop.permute.xlu1 %227 }
  0xa3   :  { %v962_v34 = vcombine.low %v293_v61, %v296_v42  ;;  %v308_v38 = vsel %vm230_vm0, %v1346_v47, %v228_v55  ;;  %p1186_p3 = por %p1185_p2, %p1184_p1 }
  0xa5   :  { %820 = vmatmul.mubr.bf16.gmra.mrb[8].mxu1 %v962_v34  ;;  %v183_v35 = vpop.permute.xlu0 %182  ;;  %p1187_p4 = pnand %p1186_p3, %p1180_p0 }
  0xa6   :  { %v275_v37 = vsel %vm230_vm0, %v1471_v48, %v183_v35  ;;  %v212_v16 = vpop.permute.xlu1 %211 }
  0xa7   :  { %v965_v54 = vcombine.low %v275_v37, %v278_v63  ;;  %v302_v41 = vsel %vm230_vm0, %v1530_v23, %v212_v16 }
  0xa9   :  { %762 = vmatprep.mubr.bf16.mxu0 %v965_v54  ;;  %v226_v53 = vpop.permute.xlu0 %225 }
  0xaa   :  { %v305_v13 = vsel %vm230_vm0, %v1333_v44, %v226_v53  ;;  %763 = vmatmul.mubr.bf16.gmra.mrb[12].mxu0 %v963_v20 }
  0xab   :  { %v967_v40 = vcombine.low %v305_v13, %v308_v38  ;;  %1105 = vmatprep.mubr.msk.bf16.mxu0 %vm230_vm0, %v956_v46 }
  0xad   :  { %827 = vmatprep.mubr.bf16.mxu1 %v967_v40  ;;  %v210_v4 = vpop.permute.xlu0 %209 }
  0xae   :  { %v299_v47 = vsel %vm230_vm0, %v1436_v30, %v210_v4 }
  0xaf   :  { %v966_v57 = vcombine.low %v299_v47, %v302_v41 }
  0xb1   :  { %828 = vmatmul.mubr.bf16.gmra.mrb[12].mxu1 %v966_v57 }
  0xb2   :  { %1106 = vmatmul.mubr.msk.bf16.vlgmr.msra.gmra.mrb[16].mxu0 %vm230_vm0, %v960_v36  ;;  %1109 = vmatprep.mubr.msk.bf16.mxu1 %vm230_vm0, %v964_v33 }
  0xb9   :  { %1110 = vmatmul.mubr.msk.bf16.vlgmr.msra.gmra.mrb[16].mxu1 %vm230_vm0, %v1402_v10 }
 0x15c   :  { %v1025_v44 = vpop.f32.mrb[0].mxu0 }
 0x15d   :  { %v1026_v23 = vpop.f32.mrb[1].mxu0 }
 0x15e   :  { %v1027_v43 = vadd.f32 %v1026_v23, %v1025_v44  ;;  %v1028_v45 = vpop.f32.mrb[2].mxu0 }
 0x15f   :  { %v1029_v30 = vpop.f32.mrb[3].mxu0 }
 0x160   :  { %v1030_v8 = vadd.f32 %v1029_v30, %v1028_v45  ;;  %v1065_v48 = vpop.f32.mrb[0].mxu1  ;;  %v741_v49 = vadd.f32 %v1027_v43, %v951_v60 }
 0x161   :  { %v1066_v24 = vpop.f32.mrb[1].mxu1 }
 0x162   :  { %v1067_v5 = vadd.f32 %v1066_v24, %v1065_v48  ;;  %v1068_v7 = vpop.f32.mrb[2].mxu1  ;;  %v744_v0 = vadd.f32 %v1030_v8, %v951_v60 }
 0x163   :  { %v1069_v50 = vpop.f32.mrb[3].mxu1 }
 0x164   :  { %v1070_v51 = vadd.f32 %v1069_v50, %v1068_v7  ;;  %v806_v11 = vadd.f32 %v1067_v5, %v741_v49 }
 0x166   :  { %v809_v10 = vadd.f32 %v1070_v51, %v744_v0 }
 0x169   :  { %v1031_v52 = vpop.f32.mrb[4].mxu0 }
 0x16a   :  { %v1032_v58 = vpop.f32.mrb[5].mxu0 }
 0x16b   :  { %v1033_v31 = vadd.f32 %v1032_v58, %v1031_v52  ;;  %v1034_v59 = vpop.f32.mrb[6].mxu0 }
 0x16c   :  { %v1035_v28 = vpop.f32.mrb[7].mxu0  ;;  %v1071_v62 = vpop.f32.mrb[4].mxu1 }
 0x16d   :  { %v749_v1 = vadd.f32 %v1033_v31, %v951_v60  ;;  %v1036_v17 = vadd.f32 %v1035_v28, %v1034_v59  ;;  %v1072_v2 = vpop.f32.mrb[5].mxu1 }
 0x16e   :  { %v1073_v3 = vadd.f32 %v1072_v2, %v1071_v62  ;;  %v1074_v29 = vpop.f32.mrb[6].mxu1 }
 0x16f   :  { %v752_v6 = vadd.f32 %v1036_v17, %v951_v60  ;;  %v1075_v56 = vpop.f32.mrb[7].mxu1 }
 0x170   :  { %v1076_v9 = vadd.f32 %v1075_v56, %v1074_v29  ;;  %v814_v12 = vadd.f32 %v1073_v3, %v749_v1 }
 0x172   :  { %v817_v15 = vadd.f32 %v1076_v9, %v752_v6 }
 0x175   :  { %v1037_v18 = vpop.f32.mrb[8].mxu0 }
 0x176   :  { %v1038_v26 = vpop.f32.mrb[9].mxu0 }
 0x177   :  { %v1039_v19 = vadd.f32 %v1038_v26, %v1037_v18  ;;  %v1040_v14 = vpop.f32.mrb[10].mxu0 }
 0x178   :  { %v1041_v20 = vpop.f32.mrb[11].mxu0  ;;  %v1077_v39 = vpop.f32.mrb[8].mxu1 }
 0x179   :  { %v757_v21 = vadd.f32 %v1039_v19, %v951_v60  ;;  %v1042_v22 = vadd.f32 %v1041_v20, %v1040_v14  ;;  %v1078_v25 = vpop.f32.mrb[9].mxu1 }
 0x17a   :  { %v1079_v27 = vadd.f32 %v1078_v25, %v1077_v39  ;;  %v1080_v42 = vpop.f32.mrb[10].mxu1 }
 0x17b   :  { %v760_v32 = vadd.f32 %v1042_v22, %v951_v60  ;;  %v1081_v61 = vpop.f32.mrb[11].mxu1 }
 0x17c   :  { %v1082_v34 = vadd.f32 %v1081_v61, %v1080_v42  ;;  %v822_v55 = vadd.f32 %v1079_v27, %v757_v21 }
 0x17d   :  { %v1043_v63 = vpop.f32.mrb[12].mxu0 }
 0x17e   :  { %v1044_v35 = vpop.f32.mrb[13].mxu0  ;;  %v825_v37 = vadd.f32 %v1082_v34, %v760_v32 }
 0x17f   :  { %v1045_v54 = vadd.f32 %v1044_v35, %v1043_v63  ;;  %v1046_v46 = vpop.f32.mrb[14].mxu0 }
 0x180   :  { %v1047_v38 = vpop.f32.mrb[15].mxu0 }
 0x181   :  { %v1048_v53 = vadd.f32 %v1047_v38, %v1046_v46  ;;  %v765_v41 = vadd.f32 %v1045_v54, %v951_v60 }
 0x183   :  { %v768_v57 = vadd.f32 %v1048_v53, %v951_v60 }
 0x184   :  { %v1083_v16 = vpop.f32.mrb[12].mxu1 }
 0x185   :  { %v1084_v13 = vpop.f32.mrb[13].mxu1  ;;  %v1107_v40 = vpop.f32.mrb[16].mxu0 }
 0x186   :  { %v1085_v4 = vadd.f32 %v1084_v13, %v1083_v16  ;;  %v879_v36 = vadd.f32 %v1107_v40, %v814_v12  ;;  %v1086_v47 = vpop.f32.mrb[14].mxu1  ;;  %v870_v33 = vpop.f32.mrb[17].mxu0 }
 0x187   :  { %v871_v44 = vadd.f32 %v870_v33, %v806_v11  ;;  %v1087_v23 = vpop.f32.mrb[15].mxu1  ;;  %v1108_v43 = vpop.f32.mrb[18].mxu0 }
 0x188   :  { %v903_v45 = vmax.f32 %v879_v36, 0.0  ;;  %v1088_v30 = vadd.f32 %v1087_v23, %v1086_v47  ;;  %v882_v8 = vadd.f32 %v1108_v43, %v817_v15  ;;  %v873_v48 = vpop.f32.mrb[19].mxu0  ;;  %v830_v24 = vadd.f32 %v1085_v4, %v765_v41 }
 0x189   :  { %v901_v49 = vmax.f32 %v871_v44, 0.0  ;;  %v874_v5 = vadd.f32 %v873_v48, %v809_v10 }
 0x18a   :  { %911 = vst.msk [vmem:[#allocation2 + $0x10] sm:$0xff] %vm230_vm0, %v903_v45  ;;  %v904_v7 = vmax.f32 %v882_v8, 0.0  ;;  %v833_v50 = vadd.f32 %v1088_v30, %v768_v57 }
 0x18b   :  { %909 = vst.msk [vmem:[#allocation2] sm:$0xff] %vm230_vm0, %v901_v49  ;;  %v902_v0 = vmax.f32 %v874_v5, 0.0 }
 0x18c   :  { %912 = vst.msk [vmem:[#allocation2 + $0x18] sm:$0xff] %vm230_vm0, %v904_v7  ;;  %v1111_v60 = vpop.f32.mrb[16].mxu1 }
 0x18d   :  { %910 = vst.msk [vmem:[#allocation2 + $0x8] sm:$0xff] %vm230_vm0, %v902_v0  ;;  %v895_v51 = vadd.f32 %v1111_v60, %v830_v24  ;;  %v886_v11 = vpop.f32.mrb[17].mxu1 }
 0x18e   :  { %v887_v52 = vadd.f32 %v886_v11, %v822_v55  ;;  %v1112_v58 = vpop.f32.mrb[18].mxu1 }
 0x18f   :  { %v907_v31 = vmax.f32 %v895_v51, 0.0  ;;  %v898_v10 = vadd.f32 %v1112_v58, %v833_v50  ;;  %v889_v59 = vpop.f32.mrb[19].mxu1 }
 0x190   :  { %v905_v28 = vmax.f32 %v887_v52, 0.0  ;;  %v890_v62 = vadd.f32 %v889_v59, %v825_v37 }
 0x191   :  { %915 = vst.msk [vmem:[#allocation2 + $0x30] sm:$0xff] %vm230_vm0, %v907_v31  ;;  %v908_v1 = vmax.f32 %v898_v10, 0.0 }
 0x192   :  { %913 = vst.msk [vmem:[#allocation2 + $0x20] sm:$0xff] %vm230_vm0, %v905_v28  ;;  %v906_v17 = vmax.f32 %v890_v62, 0.0 }
 0x193   :  { %916 = vst.msk [vmem:[#allocation2 + $0x38] sm:$0xff] %vm230_vm0, %v908_v1 }
 0x194   :  { %914 = vst.msk [vmem:[#allocation2 + $0x28] sm:$0xff] %vm230_vm0, %v906_v17 }
 0x195   :  { %1190 = shalt.err (!%p1187_p4)
}
 0x196   :  { %s1191_s21 = scalar_lea.hbm %s1641_s3, 1024 }
 0x197   :  { %p1192_p5 = scmp.ne.s32.totalorder %s1641_s3, %s1191_s21  ;;  %p1195_p6 = scmp.lt.u32.totalorder %s1191_s21, %s1641_s3 }
 0x199   :  { %p1197_p7 = pnand %p1195_p6, %p1192_p5 }
 0x19b   :  { %1200 = shalt.err (!%p1197_p7)
}
 0x19c   :  { %s1205_s26 = smov 128   ;;  %s1206_s27 = smov 8  }
 0x19d   :  { %928 = dma.vmem_to_hbm [thread:$0]  %s923_s0, 1024, %s1641_s3, [#allocation3], %s1205_s26, %s1205_s26, %s1206_s27  }
 0x19e   :  { %1201 = dma.done.wait [#allocation3], 1024  }
 0x19f   :  { %1202 = vsyncadd [#allocation3], 4294966272 }
 0x1a0   :  { %932 = vsyncpa [#allocation3], 1 }

</bundles_post_ra>
